<compile_context>
chip_gen: v7x
topology: tpu7x:2x2x1
jax: 0.10.0
libtpu: 0.0.40
codegen_flags: <defaults>
</compile_context>

<pallas_src>
import numpy as np
import jax
import jax.numpy as jnp
from jax.experimental import pallas as pl
from jax.experimental.pallas import tpu as pltpu


def _pair(v):
    if isinstance(v, (tuple, list)):
        return (int(v[0]), int(v[1]))
    return (int(v), int(v))


def _round_up(a, b):
    return (a + b - 1) // b * b


def _pool_matrix(in_size, k, s, pad, scale):
    """(out_size, in_size) matrix with M[o, i] = scale if input index i is inside
    the o-th pooling window (floor output sizing, zero padding), else 0."""
    out_size = (in_size + 2 * pad - k) // s + 1
    m = np.zeros((out_size, in_size), dtype=np.float32)
    for o in range(out_size):
        start = o * s - pad
        for i in range(start, start + k):
            if 0 <= i < in_size:
                m[o, i] = scale
    return m, out_size


def _avgpool_kernel(mt_ref, x_ref, o_ref):
    # mt: (H*W*2, out_h*out_w*2) resident pooling matrix
    # x block: (TB, H*W*2)  ->  o block: (TB, out_h*out_w*2)
    o_ref[...] = jnp.dot(
        x_ref[...],
        mt_ref[...],
        preferred_element_type=jnp.float32,
        precision=jax.lax.Precision.HIGHEST,
    )


def complex_avg_pool2d(x, kernel_size, stride=None, padding=0, dilation=1,
                       ceil_mode=False, return_indices=False):
    """x: complex64 array of shape (B, C, H, W).  Returns complex64 (B, C, oH, oW)."""
    assert not ceil_mode and dilation in (1, (1, 1)) and not return_indices

    kh, kw = _pair(kernel_size)
    sh, sw = _pair(stride) if stride is not None else (kh, kw)
    pad_h, pad_w = _pair(padding)

    B, C, H, W = x.shape
    N = B * C
    scale = 1.0 / float(kh * kw)          # count_include_pad=True -> constant divisor
    ph, out_h = _pool_matrix(H, kh, sh, pad_h, scale)   # (out_h, H)
    pw, out_w = _pool_matrix(W, kw, sw, pad_w, 1.0)     # (out_w, W)

    # Fused pooling matrix over the flattened interleaved (h, w, re/im) index.
    # Column index of x_flat:  h*W*2 + w*2 + c ;  row index of output: (oh*out_w+ow)*2 + c.
    mt = np.kron(np.kron(ph, pw), np.eye(2, dtype=np.float32)).T.astype(np.float32)
    mt = jnp.asarray(mt)                  # (H*W*2, out_h*out_w*2)

    K = H * W * 2
    Kout = out_h * out_w * 2

    # Interleave re/im along the flattened spatial axis (single fused XLA pass).
    xf = jnp.stack((jnp.real(x), jnp.imag(x)), axis=-1).astype(jnp.float32)
    xf = xf.reshape(N, K)

    # Tile size: TB planes per grid step (multiple of 8), ~4 MiB of input per block,
    # but keep several grid steps when there are many planes (v7x has 2 TCs).
    row_bytes = K * 4
    tb = max(8, min(1024, (4 * 1024 * 1024 // row_bytes) // 8 * 8))
    n_pad8 = _round_up(N, 8)
    tb = min(tb, max(8, _round_up(-(-n_pad8 // 8), 8)))
    tb = min(tb, n_pad8)
    n_pad = _round_up(N, tb)
    if n_pad != N:
        xf = jnp.pad(xf, ((0, n_pad - N), (0, 0)))
    grid = n_pad // tb

    grid_spec = pltpu.PrefetchScalarGridSpec(
        num_scalar_prefetch=0,
        grid=(grid,),
        in_specs=[
            pl.BlockSpec((K, Kout), lambda i: (0, 0)),   # pooling matrix, resident
            pl.BlockSpec((tb, K), lambda i: (i, 0)),     # TB planes, lane-dense rows
        ],
        out_specs=pl.BlockSpec((tb, Kout), lambda i: (i, 0)),
    )

    y_flat = pl.pallas_call(
        _avgpool_kernel,
        out_shape=jax.ShapeDtypeStruct((n_pad, Kout), jnp.float32),
        grid_spec=grid_spec,
        compiler_params=pltpu.CompilerParams(
            dimension_semantics=("parallel",),
            vmem_limit_bytes=48 * 1024 * 1024,
        ),
    )(mt, xf)

    y = y_flat[:N].reshape(B, C, out_h, out_w, 2)
    return jax.lax.complex(y[..., 0], y[..., 1])   # complex64, matching .type(torch.complex64)


class ComplexAvgPool2d:
    def __init__(self, kernel_size, stride=None, padding=0, dilation=1,
                 return_indices=False, ceil_mode=False):
        self.kernel_size = kernel_size
        self.stride = stride
        self.padding = padding
        self.dilation = dilation
        self.ceil_mode = ceil_mode
        self.return_indices = return_indices

    def __call__(self, x):
        return complex_avg_pool2d(
            x,
            kernel_size=self.kernel_size,
            stride=self.stride,
            padding=self.padding,
            dilation=self.dilation,
            ceil_mode=self.ceil_mode,
            return_indices=self.return_indices,
        )


def _ref_avg_pool(v, k, s, p):
    """Pure-JAX reference: avg_pool2d with count_include_pad=True on an NCHW f32 array."""
    kh, kw = k
    sh, sw = s
    ph_, pw_ = p
    summed = jax.lax.reduce_window(
        v, 0.0, jax.lax.add,
        window_dimensions=(1, 1, kh, kw),
        window_strides=(1, 1, sh, sw),
        padding=((0, 0), (0, 0), (ph_, ph_), (pw_, pw_)),
    )
    return summed / float(kh * kw)


if __name__ == "__main__":
    key = jax.random.PRNGKey(0)
    kr, ki = jax.random.split(key)
    B, C, H, W = 2, 4, 16, 16
    xr = jax.random.normal(kr, (B, C, H, W), dtype=jnp.float32)
    xi = jax.random.normal(ki, (B, C, H, W), dtype=jnp.float32)
    x = jax.lax.complex(xr, xi)  # complex64 NCHW

    for (k, s, p) in [(2, 2, 0), (3, 2, 1)]:
        pool = ComplexAvgPool2d(kernel_size=k, stride=s, padding=p)
        y = jax.block_until_ready(pool(x))

        ref = jax.lax.complex(
            _ref_avg_pool(xr, (k, k), (s, s), (p, p)),
            _ref_avg_pool(xi, (k, k), (s, s), (p, p)),
        )
        assert y.shape == ref.shape
        assert y.dtype == jnp.complex64
        np.testing.assert_allclose(np.asarray(y), np.asarray(ref), rtol=1e-5, atol=1e-5)

    print("KERNEL_OK")
</pallas_src>

<mosaic_0001>
module attributes {stable_mosaic.version = 11 : i64} {
  func.func @_avgpool_kernel(%arg0: i32, %arg1: memref<512x128xf32, #tpu.memory_space<vmem>>, %arg2: memref<8x512xf32, #tpu.memory_space<vmem>>, %arg3: memref<8x128xf32, #tpu.memory_space<vmem>>) attributes {dimension_semantics = [#tpu.dimension_semantics<parallel>], iteration_bounds = array<i64: 1>, scalar_prefetch = 0 : i64, scratch_operands = 0 : i64, tpu.core_type = #tpu.core_type<tc>, window_params = [{pipeline_mode = #tpu.pipeline_mode<synchronous>, transform_indices = @transform_0, window_bounds = array<i64: 512, 128>}, {transform_indices = @transform_1, window_bounds = array<i64: 8, 512>}, {transform_indices = @transform_2, window_bounds = array<i64: 8, 128>}]} {
    %c0 = arith.constant 0 : index
    %c0_0 = arith.constant 0 : index
    %0 = vector.load %arg2[%c0, %c0_0] : memref<8x512xf32, #tpu.memory_space<vmem>>, vector<8x512xf32>
    %c0_1 = arith.constant 0 : index
    %c0_2 = arith.constant 0 : index
    %1 = vector.load %arg1[%c0_1, %c0_2] : memref<512x128xf32, #tpu.memory_space<vmem>>, vector<512x128xf32>
    %cst = arith.constant dense<0.000000e+00> : vector<8x128xf32>
    %2 = tpu.matmul %0, %1, %cst {dimension_numbers = #tpu.dot_dimension_numbers<[1], [0], [0], [1], [0, 0, 1, 1], [], []>, precision = #tpu.contract_precision<fp32>} : vector<8x512xf32>, vector<512x128xf32>, vector<8x128xf32> -> vector<8x128xf32>
    %c0_3 = arith.constant 0 : index
    %c0_4 = arith.constant 0 : index
    %3 = vector.load %arg3[%c0_3, %c0_4] : memref<8x128xf32, #tpu.memory_space<vmem>>, vector<8x128xf32>
    tpu.vector_store %arg3[%c0_3, %c0_4], %2 {strides = array<i32>} : memref<8x128xf32, #tpu.memory_space<vmem>>, vector<8x128xf32>,
    return
  }
  func.func @transform_0(%arg0: i32) -> (i32, i32) {
    %c0_i32 = arith.constant 0 : i32
    %c0_i32_0 = arith.constant 0 : i32
    %c0_i32_1 = arith.constant 0 : i32
    return %c0_i32, %c0_i32_0 : i32, i32
  }
  func.func @transform_1(%arg0: i32) -> (i32, i32) {
    %c0_i32 = arith.constant 0 : i32
    %c0_i32_0 = arith.constant 0 : i32
    return %arg0, %c0_i32 : i32, i32
  }
  func.func @transform_2(%arg0: i32) -> (i32, i32) {
    %c0_i32 = arith.constant 0 : i32
    %c0_i32_0 = arith.constant 0 : i32
    return %arg0, %c0_i32 : i32, i32
  }
}

</mosaic_0001>

<bundles_post_ra>
// kernel: tpu_custom_call.1
= control target key start
LH: loop header
LB: loop body
LE: loop exit
PB: predicated region body
PF: predicated region fallthrough
CT: control target
= control target key end

     0   :  { %7 = vsyncpa [#allocation3], 0  ;;  %s3653_s0 = inlined_call_operand.hbm [shape: f32[512,128], index: 0, kind: input, shape index: {}]   ;;  %s3654_s1 = inlined_call_operand.hbm [shape: f32[8,512], index: 1, kind: input, shape index: {}]   ;;  %s3655_s2 = inlined_call_operand.hbm [shape: f32[8,128], index: 2, kind: output, shape index: {}]  }
   0x1   :  { %8 = vsyncpa [#allocation6], 0 }
   0x2   :  { %9 = vsyncpa [#allocation4], 0  ;;  %s2728_s9 = smov [#allocation2]   ;;  %s2656_s13 = scalar_lea.hbm %s3653_s0, 8192 }
   0x3   :  { %s15_s10 = sshll.u32 %s2728_s9, 4  ;;  %p2657_p0 = scmp.ne.s32.totalorder %s3653_s0, %s2656_s13  ;;  %s16_s10 = int_to_ptr.vmem [resolvable:$true] %s15_s10 }
   0x4   :  { %p2660_p1 = scmp.lt.u32.totalorder %s2656_s13, %s3653_s0 }
   0x6   :  { %p2662_p2 = pnand %p2660_p1, %p2657_p0 }
   0x8   :  { %2665 = shalt.err (!%p2662_p2)
}
   0x9   :  { %s2666_s18 = scalar_lea.vmem %s16_s10, 8192  ;;  %p2671_p4 = scmp.lt.s32.totalorder %s16_s10, %s16_s10 }
   0xa   :  { %p2667_p3 = scmp.ne.s32.totalorder %s16_s10, %s2666_s18  ;;  %p2672_p5 = scmp.lt.s32.totalorder %s2666_s18, %s2666_s18 }
   0xc   :  { %p2673_p6 = por %p2672_p5, %p2671_p4 }
   0xe   :  { %p2674_p7 = pnand %p2673_p6, %p2667_p3 }
  0x10   :  { %2677 = shalt.err (!%p2674_p7)
}
  0x11   :  { %s2729_s19 = smov 128   ;;  %s2730_s20 = smov 8  }
  0x12   :  { %21 = dma.hbm_to_vmem [thread:$0]  %s3653_s0, 8192, %s16_s10, [#allocation3], %s2729_s19, %s2729_s19, %s2730_s20  }
  0x13   :  { %s2731_s23 = smov [#allocation5]   ;;  %s2678_s27 = scalar_lea.hbm %s3654_s1, 512 }
  0x14   :  { %s28_s24 = sshll.u32 %s2731_s23, 4  ;;  %p2679_p8 = scmp.ne.s32.totalorder %s3654_s1, %s2678_s27  ;;  %s29_s24 = int_to_ptr.vmem [resolvable:$true] %s28_s24 }
  0x15   :  { %p2682_p9 = scmp.lt.u32.totalorder %s2678_s27, %s3654_s1 }
  0x17   :  { %p2684_p10 = pnand %p2682_p9, %p2679_p8 }
  0x19   :  { %2687 = shalt.err (!%p2684_p10)
}
  0x1a   :  { %s2688_s4 = scalar_lea.vmem %s29_s24, 512  ;;  %p2693_p12 = scmp.lt.s32.totalorder %s29_s24, %s29_s24 }
  0x1b   :  { %p2689_p11 = scmp.ne.s32.totalorder %s29_s24, %s2688_s4  ;;  %p2694_p13 = scmp.lt.s32.totalorder %s2688_s4, %s2688_s4 }
  0x1d   :  { %p2695_p0 = por %p2694_p13, %p2693_p12 }
  0x1f   :  { %p2696_p1 = pnand %p2695_p0, %p2689_p11 }
  0x21   :  { %2699 = shalt.err (!%p2696_p1)
}
  0x22   :  { %31 = dma.hbm_to_vmem [thread:$0]  %s3654_s1, 512, %s29_s24, [#allocation6]  }
  0x23   :  { %2722 = dma.done.wait [#allocation3], 8192  }
  0x24   :  { %2723 = vsyncadd [#allocation3], 4294959104 }
  0x25   :  { %2724 = dma.done.wait [#allocation6], 512  }
  0x26   :  { %2725 = vsyncadd [#allocation6], 4294966784  ;;  %v58_v0 = vld [vmem:[#allocation2 + $0x80] sm:$0xff]  ;;  %v59_v1 = vld [vmem:[#allocation2 + $0x88] sm:$0xff]  ;;  %s2732_s1 = smov [#allocation7]  }
  0x27   :  { %v42_v2 = vld [vmem:[#allocation2] sm:$0xff]  ;;  %v155_v3 = vand.u32 4294901760, %v58_v0  ;;  %v158_v4 = vand.u32 4294901760, %v59_v1  ;;  %v43_v5 = vld [vmem:[#allocation2 + $0x8] sm:$0xff]  ;;  %v60_v7 = vld [vmem:[#allocation2 + $0x90] sm:$0xff]  ;;  %s1837_s6 = sshll.u32 %s2732_s1, 4  ;;  %s1838_s6 = int_to_ptr.vmem [resolvable:$true] %s1837_s6 }
  0x28   :  { %v107_v6 = vand.u32 4294901760, %v42_v2  ;;  %v61_v8 = vld [vmem:[#allocation2 + $0x98] sm:$0xff]  ;;  %v110_v9 = vand.u32 4294901760, %v43_v5  ;;  %v161_v10 = vand.u32 4294901760, %v60_v7  ;;  %v44_v12 = vld [vmem:[#allocation2 + $0x10] sm:$0xff]  ;;  %v62_v18 = vld [vmem:[#allocation2 + $0xa0] sm:$0xff]  ;;  %p2705_p3 = scmp.lt.s32.totalorder %s1838_s6, %s1838_s6 }
  0x29   :  { %v164_v11 = vand.u32 4294901760, %v61_v8  ;;  %v45_v13 = vld [vmem:[#allocation2 + $0x18] sm:$0xff]  ;;  %v2772_v14 = vpack.c.bf16 %v158_v4, %v155_v3  ;;  %v113_v16 = vand.u32 4294901760, %v44_v12  ;;  %v63_v19 = vld [vmem:[#allocation2 + $0xa8] sm:$0xff]  ;;  %v46_v23 = vld [vmem:[#allocation2 + $0x20] sm:$0xff]  ;;  %v167_v29 = vand.u32 4294901760, %v62_v18 }
  0x2a   :  { %v2774_v15 = vsub.f32 %v42_v2, %v107_v6  ;;  %v116_v17 = vand.u32 4294901760, %v45_v13  ;;  %v2776_v20 = vpack.c.bf16 %v110_v9, %v107_v6  ;;  %v2778_v21 = vsub.f32 %v43_v5, %v110_v9  ;;  %v47_v24 = vld [vmem:[#allocation2 + $0x28] sm:$0xff]  ;;  %v64_v37 = vld [vmem:[#allocation2 + $0xb0] sm:$0xff]  ;;  %v65_v42 = vld [vmem:[#allocation2 + $0xb8] sm:$0xff]  ;;  %s2700_s7 = scalar_lea.vmem %s1838_s6, 128 }
  0x2b   :  { %v2780_v22 = vpack.c.bf16 %v164_v11, %v161_v10  ;;  %2268 = vmatprep.subr.bf16.mxu0 %v2772_v14  ;;  %v2783_v25 = vsub.f32 %v60_v7, %v161_v10  ;;  %v2785_v26 = vsub.f32 %v61_v8, %v164_v11  ;;  %v2789_v28 = vsub.f32 %v44_v12, %v113_v16  ;;  %v48_v55 = vld [vmem:[#allocation2 + $0x30] sm:$0xff]  ;;  %v49_v56 = vld [vmem:[#allocation2 + $0x38] sm:$0xff]  ;;  %v66_v5 = vld [vmem:[#allocation2 + $0xc0] sm:$0xff]  ;;  %p2701_p2 = scmp.ne.s32.totalorder %s1838_s6, %s2700_s7  ;;  %p2706_p4 = scmp.lt.s32.totalorder %s2700_s7, %s2700_s7 }
  0x2c   :  { %v2787_v27 = vpack.c.bf16 %v116_v17, %v113_v16  ;;  %2270 = vmatpush3.bf16.msra.mxu0 %v2776_v20  ;;  %v170_v30 = vand.u32 4294901760, %v63_v19  ;;  %v2792_v31 = vsub.f32 %v58_v0, %v155_v3  ;;  %v2794_v32 = vsub.f32 %v59_v1, %v158_v4  ;;  %v67_v6 = vld [vmem:[#allocation2 + $0xc8] sm:$0xff]  ;;  %v50_v11 = vld [vmem:[#allocation2 + $0x40] sm:$0xff] }
  0x2d   :  { %2272 = vmatprep.subr.bf16.mxu0 %v2780_v22  ;;  %v119_v33 = vand.u32 4294901760, %v46_v23  ;;  %v122_v34 = vand.u32 4294901760, %v47_v24  ;;  %v3671_v35 = vand.u32 4294901760, %v2774_v15  ;;  %v3670_v36 = vand.u32 4294901760, %v2778_v21  ;;  %p2707_p5 = por %p2706_p4, %p2705_p3 }
  0x2e   :  { %v2799_v38 = vsub.f32 %v45_v13, %v116_v17  ;;  %v2801_v39 = vpack.c.bf16 %v170_v30, %v167_v29  ;;  %v2803_v40 = vsub.f32 %v62_v18, %v167_v29  ;;  %v3675_v41 = vand.u32 4294901760, %v2792_v31  ;;  %v51_v29 = vld [vmem:[#allocation2 + $0x48] sm:$0xff] }
  0x2f   :  { %v2806_v43 = vsub.f32 %v63_v19, %v170_v30  ;;  %v3673_v44 = vand.u32 4294901760, %v2794_v32  ;;  %v2809_v45 = vpack.c.bf16 %v122_v34, %v119_v33  ;;  %v2811_v46 = vsub.f32 %v46_v23, %v119_v33  ;;  %p2708_p6 = pnand %p2707_p5, %p2701_p2 }
  0x30   :  { %2274 = vmatpush3.bf16.msra.mxu0 %v2787_v27  ;;  %v334_v47 = vsub.f32 %v2792_v31, %v3675_v41  ;;  %v222_v48 = vsub.f32 %v2774_v15, %v3671_v35  ;;  %v229_v49 = vsub.f32 %v2778_v21, %v3670_v36  ;;  %v173_v50 = vand.u32 4294901760, %v64_v37  ;;  %v39_v41 = vld [vmem:[#allocation5 + $0x8] sm:$0xff] }
  0x31   :  { %2276 = vmatprep.subr.bf16.mxu0 %v2801_v39  ;;  %v341_v51 = vsub.f32 %v2794_v32, %v3673_v44  ;;  %v176_v52 = vand.u32 4294901760, %v65_v42  ;;  %v3668_v53 = vand.u32 4294901760, %v2783_v25  ;;  %v3666_v54 = vand.u32 4294901760, %v2785_v26 }
  0x32   :  { %v335_v57 = vand.u32 4294901760, %v334_v47  ;;  %v2829_v58 = vsub.f32 %v47_v24, %v122_v34  ;;  %v223_v59 = vand.u32 4294901760, %v222_v48  ;;  %v230_v60 = vand.u32 4294901760, %v229_v49 }
  0x33   :  { %v342_v61 = vand.u32 4294901760, %v341_v51  ;;  %v2831_v62 = vpack.c.bf16 %v176_v52, %v173_v50  ;;  %v2833_v63 = vsub.f32 %v64_v37, %v173_v50  ;;  %v348_v0 = vsub.f32 %v2783_v25, %v3668_v53 }
  0x34   :  { %2278 = vmatpush3.bf16.msra.mxu0 %v2809_v45  ;;  %v2301_v1 = vpack.c.bf16 %v230_v60, %v223_v59  ;;  %v355_v2 = vsub.f32 %v2785_v26, %v3666_v54  ;;  %v125_v3 = vand.u32 4294901760, %v48_v55  ;;  %v128_v4 = vand.u32 4294901760, %v49_v56  ;;  %v69_v59 = vld [vmem:[#allocation2 + $0xd8] sm:$0xff] }
  0x35   :  { %v2299_v7 = vpack.c.bf16 %v342_v61, %v335_v57  ;;  %2280 = vmatprep.subr.bf16.mxu0 %v2831_v62  ;;  %v349_v8 = vand.u32 4294901760, %v348_v0  ;;  %v3665_v9 = vand.u32 4294901760, %v2789_v28  ;;  %v3663_v10 = vand.u32 4294901760, %v2799_v38  ;;  %v68_v57 = vld [vmem:[#allocation2 + $0xd0] sm:$0xff]  ;;  %v73_v54 = vld [vmem:[#allocation2 + $0xf8] sm:$0xff] }
  0x36   :  { %v2845_v12 = vsub.f32 %v65_v42, %v176_v52  ;;  %v356_v13 = vand.u32 4294901760, %v355_v2  ;;  %v2847_v16 = vpack.c.bf16 %v128_v4, %v125_v3  ;;  %v2849_v17 = vsub.f32 %v48_v55, %v125_v3 }
  0x37   :  { %2300 = vmatprep.subr.bf16.mxu1 %v2299_v7  ;;  %v236_v18 = vsub.f32 %v2789_v28, %v3665_v9  ;;  %v243_v19 = vsub.f32 %v2799_v38, %v3663_v10  ;;  %v179_v23 = vand.u32 4294901760, %v66_v5  ;;  %v182_v24 = vand.u32 4294901760, %v67_v6  ;;  %v72_v9 = vld [vmem:[#allocation2 + $0xf0] sm:$0xff] }
  0x38   :  { %2302 = vmatpush3.bf16.msra.mxu1 %v2301_v1  ;;  %v2303_v30 = vpack.c.bf16 %v356_v13, %v349_v8  ;;  %2282 = vmatpush3.bf16.msra.mxu0 %v2847_v16  ;;  %v3661_v33 = vand.u32 4294901760, %v2803_v40  ;;  %v3660_v34 = vand.u32 4294901760, %v2806_v43  ;;  %v131_v37 = vand.u32 4294901760, %v50_v11  ;;  %v52_v1 = vld [vmem:[#allocation2 + $0x50] sm:$0xff] }
  0x39   :  { %v2860_v42 = vsub.f32 %v49_v56, %v128_v4  ;;  %v237_v47 = vand.u32 4294901760, %v236_v18  ;;  %v244_v48 = vand.u32 4294901760, %v243_v19  ;;  %v2862_v49 = vpack.c.bf16 %v182_v24, %v179_v23  ;;  %v53_v18 = vld [vmem:[#allocation2 + $0x58] sm:$0xff] }
  0x3a   :  { %2304 = vmatprep.subr.bf16.mxu1 %v2303_v30  ;;  %v2864_v50 = vsub.f32 %v66_v5, %v179_v23  ;;  %v362_v51 = vsub.f32 %v2803_v40, %v3661_v33  ;;  %v369_v52 = vsub.f32 %v2806_v43, %v3660_v34  ;;  %v134_v55 = vand.u32 4294901760, %v51_v29 }
  0x3b   :  { %v2305_v56 = vpack.c.bf16 %v244_v48, %v237_v47  ;;  %2284 = vmatprep.subr.bf16.mxu0 %v2862_v49  ;;  %v2873_v60 = vsub.f32 %v67_v6, %v182_v24  ;;  %v3658_v61 = vand.u32 4294901760, %v2811_v46  ;;  %v3656_v0 = vand.u32 4294901760, %v2829_v58 }
  0x3c   :  { %v363_v2 = vand.u32 4294901760, %v362_v51  ;;  %v370_v3 = vand.u32 4294901760, %v369_v52  ;;  %v2877_v4 = vpack.c.bf16 %v134_v55, %v131_v37  ;;  %v2879_v5 = vsub.f32 %v50_v11, %v131_v37 }
  0x3d   :  { %2306 = vmatpush3.bf16.msra.mxu1 %v2305_v56  ;;  %v250_v7 = vsub.f32 %v2811_v46, %v3658_v61  ;;  %v257_v6 = vsub.f32 %v2829_v58, %v3656_v0  ;;  %v185_v8 = vand.u32 4294901760, %v68_v57  ;;  %v188_v13 = vand.u32 4294901760, %v69_v59  ;;  %v71_v0 = vld [vmem:[#allocation2 + $0xe8] sm:$0xff] }
  0x3e   :  { %v2307_v19 = vpack.c.bf16 %v370_v3, %v363_v2  ;;  %2286 = vmatpush3.bf16.msra.mxu0 %v2877_v4  ;;  %v3657_v23 = vand.u32 4294901760, %v2833_v63  ;;  %v3659_v11 = vand.u32 4294901760, %v2845_v12  ;;  %v137_v24 = vand.u32 4294901760, %v52_v1  ;;  %v70_v3 = vld [vmem:[#allocation2 + $0xe0] sm:$0xff] }
  0x3f   :  { %v2890_v30 = vsub.f32 %v51_v29, %v134_v55  ;;  %v251_v37 = vand.u32 4294901760, %v250_v7  ;;  %v258_v47 = vand.u32 4294901760, %v257_v6  ;;  %v2892_v48 = vpack.c.bf16 %v188_v13, %v185_v8  ;;  %v54_v6 = vld [vmem:[#allocation2 + $0x60] sm:$0xff] }
  0x40   :  { %2308 = vmatprep.subr.bf16.mxu1 %v2307_v19  ;;  %v2894_v51 = vsub.f32 %v68_v57, %v185_v8  ;;  %v376_v52 = vsub.f32 %v2833_v63, %v3657_v23  ;;  %v383_v56 = vsub.f32 %v2845_v12, %v3659_v11  ;;  %v140_v2 = vand.u32 4294901760, %v53_v18  ;;  %v55_v11 = vld [vmem:[#allocation2 + $0x68] sm:$0xff] }
  0x41   :  { %v2309_v29 = vpack.c.bf16 %v258_v47, %v251_v37  ;;  %2288 = vmatprep.subr.bf16.mxu0 %v2892_v48  ;;  %v2903_v55 = vsub.f32 %v69_v59, %v188_v13  ;;  %v3662_v7 = vand.u32 4294901760, %v2849_v17  ;;  %v3664_v57 = vand.u32 4294901760, %v2860_v42 }
  0x42   :  { %v377_v8 = vand.u32 4294901760, %v376_v52  ;;  %v384_v19 = vand.u32 4294901760, %v383_v56  ;;  %v2907_v23 = vpack.c.bf16 %v140_v2, %v137_v24  ;;  %v2909_v61 = vsub.f32 %v52_v1, %v137_v24 }
  0x43   :  { %2310 = vmatpush3.bf16.msra.mxu1 %v2309_v29  ;;  %v264_v37 = vsub.f32 %v2849_v17, %v3662_v7  ;;  %v271_v59 = vsub.f32 %v2860_v42, %v3664_v57  ;;  %v191_v13 = vand.u32 4294901760, %v70_v3  ;;  %v194_v47 = vand.u32 4294901760, %v71_v0 }
  0x44   :  { %3747 = vst [vmem:[#allocation11_spill] sm:$0xff] %v2907_v23  ;;  %v2311_v34 = vpack.c.bf16 %v384_v19, %v377_v8  ;;  %2290 = vmatpush3.bf16.msra.mxu0 %v2907_v23  ;;  %v3667_v52 = vand.u32 4294901760, %v2864_v50  ;;  %v3669_v1 = vand.u32 4294901760, %v2873_v60  ;;  %v143_v24 = vand.u32 4294901760, %v54_v6 }
  0x45   :  { %v2920_v56 = vsub.f32 %v53_v18, %v140_v2  ;;  %v265_v29 = vand.u32 4294901760, %v264_v37  ;;  %v272_v33 = vand.u32 4294901760, %v271_v59  ;;  %v2922_v7 = vpack.c.bf16 %v194_v47, %v191_v13  ;;  %v56_v37 = vld [vmem:[#allocation2 + $0x70] sm:$0xff] }
  0x46   :  { %2312 = vmatprep.subr.bf16.mxu1 %v2311_v34  ;;  %v2924_v10 = vsub.f32 %v70_v3, %v191_v13  ;;  %v390_v8 = vsub.f32 %v2864_v50, %v3667_v52  ;;  %v397_v19 = vsub.f32 %v2873_v60, %v3669_v1  ;;  %v146_v57 = vand.u32 4294901760, %v55_v11  ;;  %v57_v1 = vld [vmem:[#allocation2 + $0x78] sm:$0xff] }
  0x47   :  { %3748 = vst [vmem:[#allocation12_spill] sm:$0xff] %v2922_v7  ;;  %v2313_v18 = vpack.c.bf16 %v272_v33, %v265_v29  ;;  %2292 = vmatprep.subr.bf16.mxu0 %v2922_v7  ;;  %v2933_v2 = vsub.f32 %v71_v0, %v194_v47  ;;  %v3672_v34 = vand.u32 4294901760, %v2879_v5  ;;  %v3674_v3 = vand.u32 4294901760, %v2890_v30 }
  0x48   :  { %v391_v59 = vand.u32 4294901760, %v390_v8  ;;  %v398_v13 = vand.u32 4294901760, %v397_v19  ;;  %v2937_v52 = vpack.c.bf16 %v146_v57, %v143_v24  ;;  %v2939_v53 = vsub.f32 %v54_v6, %v143_v24 }
  0x49   :  { %2314 = vmatpush3.bf16.msra.mxu1 %v2313_v18  ;;  %v278_v33 = vsub.f32 %v2879_v5, %v3672_v34  ;;  %v285_v0 = vsub.f32 %v2890_v30, %v3674_v3  ;;  %v197_v47 = vand.u32 4294901760, %v72_v9  ;;  %v200_v29 = vand.u32 4294901760, %v73_v54 }
  0x4a   :  { %3749 = vst [vmem:[#allocation13_spill] sm:$0xff] %v2937_v52  ;;  %v2315_v36 = vpack.c.bf16 %v398_v13, %v391_v59  ;;  %2294 = vmatpush3.bf16.msra.mxu0 %v2937_v52  ;;  %v3678_v8 = vand.u32 4294901760, %v2894_v51  ;;  %v3679_v6 = vand.u32 4294901760, %v2903_v55  ;;  %v149_v24 = vand.u32 4294901760, %v56_v37 }
  0x4b   :  { %v2950_v19 = vsub.f32 %v55_v11, %v146_v57  ;;  %v279_v18 = vand.u32 4294901760, %v278_v33  ;;  %v286_v35 = vand.u32 4294901760, %v285_v0  ;;  %v2952_v34 = vpack.c.bf16 %v200_v29, %v197_v47 }
  0x4c   :  { %2316 = vmatprep.subr.bf16.mxu1 %v2315_v36  ;;  %v2954_v44 = vsub.f32 %v72_v9, %v197_v47  ;;  %v404_v59 = vsub.f32 %v2894_v51, %v3678_v8  ;;  %v411_v13 = vsub.f32 %v2903_v55, %v3679_v6  ;;  %v152_v3 = vand.u32 4294901760, %v57_v1  ;;  %v38_v9 = vld [vmem:[#allocation5] sm:$0xff] }
  0x4d   :  { %3750 = vst [vmem:[#allocation14_spill] sm:$0xff] %v2952_v34  ;;  %v2317_v52 = vpack.c.bf16 %v286_v35, %v279_v18  ;;  %2296 = vmatprep.subr.bf16.mxu0 %v2952_v34  ;;  %v2963_v11 = vsub.f32 %v73_v54, %v200_v29  ;;  %v3680_v57 = vand.u32 4294901760, %v2909_v61  ;;  %v3681_v36 = vand.u32 4294901760, %v2920_v56 }
  0x4e   :  { %v405_v33 = vand.u32 4294901760, %v404_v59  ;;  %v412_v0 = vand.u32 4294901760, %v411_v13  ;;  %v2967_v47 = vpack.c.bf16 %v152_v3, %v149_v24  ;;  %v2969_v8 = vsub.f32 %v56_v37, %v149_v24 }
  0x4f   :  { %2318 = vmatpush3.bf16.msra.mxu1 %v2317_v52  ;;  %v292_v35 = vsub.f32 %v2909_v61, %v3680_v57  ;;  %v299_v54 = vsub.f32 %v2920_v56, %v3681_v36  ;;  %v2977_v29 = vand.u32 4294901760, %v39_v41  ;;  %v3684_v18 = vand.u32 4294901760, %v2924_v10 }
  0x50   :  { %3751 = vst [vmem:[#allocation15_spill] sm:$0xff] %v2967_v47  ;;  %v2319_v6 = vpack.c.bf16 %v412_v0, %v405_v33  ;;  %2298 = vmatpush3.bf16.msra.mxu0 %v2967_v47  ;;  %v3690_v59 = vand.u32 4294901760, %v2933_v2  ;;  %v2331_v52 = vpack.c.bf16 %v2794_v32, %v2792_v31  ;;  %v2984_v37 = vand.u32 4294901760, %v38_v9 }
  0x51   :  { %3752 = vst [vmem:[#allocation16_spill] sm:$0xff] %v2977_v29  ;;  %v293_v24 = vand.u32 4294901760, %v292_v35  ;;  %v300_v13 = vand.u32 4294901760, %v299_v54  ;;  %v2987_v57 = vsub.f32 %v39_v41, %v2977_v29  ;;  %v418_v36 = vsub.f32 %v2924_v10, %v3684_v18  ;;  %443 = vmatprep.mubr.f32.mxu1 %v2977_v29 }
  0x52   :  { %2320 = vmatprep.subr.bf16.mxu1 %v2319_v6  ;;  %v425_v33 = vsub.f32 %v2933_v2, %v3690_v59  ;;  %2332 = vmatprep.subr.bf16.mxu0 %v2331_v52  ;;  %v2997_v0 = vsub.f32 %v38_v9, %v2984_v37  ;;  %v3689_v35 = vand.u32 4294901760, %v2939_v53  ;;  %v3691_v41 = vand.u32 4294901760, %v2950_v19 }
  0x53   :  { %v3001_v54 = vsub.f32 %v57_v1, %v152_v3  ;;  %v2321_v47 = vpack.c.bf16 %v300_v13, %v293_v24  ;;  %v3692_v18 = vand.u32 4294901760, %v2987_v57  ;;  %v419_v34 = vand.u32 4294901760, %v418_v36 }
  0x54   :  { %v426_v29 = vand.u32 4294901760, %v425_v33  ;;  %v210_v6 = vand.u32 4294901760, %v2997_v0  ;;  %v306_v52 = vsub.f32 %v2939_v53, %v3689_v35  ;;  %v313_v9 = vsub.f32 %v2950_v19, %v3691_v41 }
  0x55   :  { %2322 = vmatpush3.bf16.msra.mxu1 %v2321_v47  ;;  %v205_v1 = vsub.f32 %v2987_v57, %v3692_v18  ;;  %v2333_v3 = vpack.c.bf16 %v2778_v21, %v2774_v15  ;;  %v3697_v36 = vand.u32 4294901760, %v2954_v44  ;;  %v3700_v24 = vand.u32 4294901760, %v2963_v11 }
  0x56   :  { %v2323_v13 = vpack.c.bf16 %v426_v29, %v419_v34  ;;  %v211_v33 = vsub.f32 %v2997_v0, %v210_v6  ;;  %v307_v35 = vand.u32 4294901760, %v306_v52  ;;  %v314_v59 = vand.u32 4294901760, %v313_v9 }
  0x57   :  { %v206_v41 = vand.u32 4294901760, %v205_v1  ;;  %v432_v47 = vsub.f32 %v2954_v44, %v3697_v36  ;;  %v439_v18 = vsub.f32 %v2963_v11, %v3700_v24  ;;  %v3699_v7 = vand.u32 4294901760, %v2969_v8 }
  0x58   :  { %2324 = vmatprep.subr.bf16.mxu1 %v2323_v13  ;;  %v212_v23 = vand.u32 4294901760, %v211_v33  ;;  %v2325_v34 = vpack.c.bf16 %v314_v59, %v307_v35  ;;  %v2335_v29 = vpack.c.bf16 %v2785_v26, %v2783_v25  ;;  %v3698_v52 = vand.u32 4294901760, %v3001_v54 }
  0x59   :  { %207 = vmatprep.mubr.f32.mxu0 %v206_v41  ;;  %v433_v9 = vand.u32 4294901760, %v432_v47  ;;  %v440_v1 = vand.u32 4294901760, %v439_v18  ;;  %v320_v36 = vsub.f32 %v2969_v8, %v3699_v7  ;;  %v2337_v33 = vpack.c.bf16 %v2799_v38, %v2789_v28 }
  0x5a   :  { %213 = vmatmul.mubr.f32.vlgmr.msra.gmra.mrb[0].mxu0 %v212_v23  ;;  %2326 = vmatpush3.bf16.msra.mxu1 %v2325_v34  ;;  %v327_v13 = vsub.f32 %v3001_v54, %v3698_v52  ;;  %v2339_v41 = vpack.c.bf16 %v2806_v43, %v2803_v40  ;;  %v2341_v23 = vpack.c.bf16 %v2829_v58, %v2811_v46  ;;  %v3754_v34 = vand.u32 4294901760, %v2794_v32 }
  0x5b   :  { %2334 = vmatpush3.bf16.msra.mxu0 %v2333_v3  ;;  %v2327_v59 = vpack.c.bf16 %v440_v1, %v433_v9  ;;  %v321_v35 = vand.u32 4294901760, %v320_v36  ;;  %580 = vmatprep.mubr.f32.mxu0 %v2987_v57  ;;  %v2343_v47 = vpack.c.bf16 %v2845_v12, %v2833_v63  ;;  %v3753_v36 = vand.u32 4294901760, %v2792_v31 }
  0x5c   :  { %2336 = vmatprep.subr.bf16.mxu0 %v2335_v29  ;;  %v328_v18 = vand.u32 4294901760, %v327_v13  ;;  %v3755_v1 = vand.u32 4294901760, %v2774_v15  ;;  %v3756_v29 = vand.u32 4294901760, %v2778_v21  ;;  %v3757_v52 = vand.u32 4294901760, %v2783_v25 }
  0x5d   :  { %2328 = vmatprep.subr.bf16.mxu1 %v2327_v59  ;;  %v2395_v9 = vpack.c.bf16 %v3754_v34, %v3753_v36  ;;  %v3758_v59 = vand.u32 4294901760, %v2785_v26  ;;  %v3759_v24 = vand.u32 4294901760, %v2789_v28  ;;  %v3761_v31 = vand.u32 4294901760, %v2803_v40 }
  0x5e   :  { %v2329_v3 = vpack.c.bf16 %v328_v18, %v321_v35  ;;  %v2397_v13 = vpack.c.bf16 %v3756_v29, %v3755_v1  ;;  %v3760_v35 = vand.u32 4294901760, %v2799_v38  ;;  %v3762_v32 = vand.u32 4294901760, %v2806_v43  ;;  %v3776_v29 = vld [vmem:[#allocation16_spill] sm:$0xff] }
  0x5f   :  { %v2399_v7 = vpack.c.bf16 %v3758_v59, %v3757_v52  ;;  %2338 = vmatpush3.bf16.msra.mxu0 %v2337_v33  ;;  %v3763_v15 = vand.u32 4294901760, %v2811_v46  ;;  %v3764_v21 = vand.u32 4294901760, %v2829_v58  ;;  %v3765_v25 = vand.u32 4294901760, %v2833_v63  ;;  %v91_v59 = vld [vmem:[#allocation2 + $0x188] sm:$0xff] }
  0x60   :  { %v2401_v18 = vpack.c.bf16 %v3760_v35, %v3759_v24  ;;  %v2403_v36 = vpack.c.bf16 %v3762_v32, %v3761_v31  ;;  %v3766_v26 = vand.u32 4294901760, %v2845_v12  ;;  %2330 = vmatpush3.bf16.msra.mxu1 %v2329_v3  ;;  %2340 = vmatprep.subr.bf16.mxu0 %v2339_v41  ;;  %v3767_v28 = vand.u32 4294901760, %v2849_v17  ;;  %v74_v35 = vld [vmem:[#allocation2 + $0x100] sm:$0xff]  ;;  %v75_v31 = vld [vmem:[#allocation2 + $0x108] sm:$0xff]  ;;  %v3777_v32 = vld [vmem:[#allocation13_spill] sm:$0xff] }
  0x61   :  { %v3070_v34 = vpack.c.bf16 %v3764_v21, %v3763_v15  ;;  %v3768_v38 = vand.u32 4294901760, %v2860_v42  ;;  %v3769_v43 = vand.u32 4294901760, %v2864_v50  ;;  %v3770_v46 = vand.u32 4294901760, %v2873_v60  ;;  %2364 = vmatprep.subr.bf16.mxu1 %v2772_v14  ;;  %v3778_v15 = vld [vmem:[#allocation14_spill] sm:$0xff] }
  0x62   :  { %v3076_v52 = vpack.c.bf16 %v3766_v26, %v3765_v25  ;;  %v3771_v63 = vand.u32 4294901760, %v2879_v5  ;;  %v3772_v12 = vand.u32 4294901760, %v2890_v30  ;;  %v2345_v33 = vpack.c.bf16 %v2860_v42, %v2849_v17 }
  0x63   :  { %v3082_v40 = vpack.c.bf16 %v3768_v38, %v3767_v28  ;;  %v3088_v58 = vpack.c.bf16 %v3770_v46, %v3769_v43  ;;  %445 = vmatmul.mubr.f32.vlgmr.msra.gmra.mrb[0].mxu1 %v2984_v37  ;;  %2342 = vmatpush3.bf16.msra.mxu0 %v2341_v23  ;;  %v2347_v41 = vpack.c.bf16 %v2873_v60, %v2864_v50  ;;  %v3773_v3 = vand.u32 4294901760, %v2987_v57  ;;  %v3774_v57 = vld [vmem:[#allocation11_spill] sm:$0xff]  ;;  %v3775_v23 = vld [vmem:[#allocation12_spill] sm:$0xff] }
  0x64   :  { %v3094_v24 = vpack.c.bf16 %v3772_v12, %v3771_v63  ;;  %2366 = vmatpush3.bf16.msra.mxu1 %v2776_v20  ;;  %2344 = vmatprep.subr.bf16.mxu0 %v2343_v47  ;;  %v2349_v1 = vpack.c.bf16 %v2890_v30, %v2879_v5  ;;  %v2351_v17 = vpack.c.bf16 %v2903_v55, %v2894_v51  ;;  %v90_v47 = vld [vmem:[#allocation2 + $0x180] sm:$0xff]  ;;  %v1020_v25 = vand.u32 4294901760, %v91_v59  ;;  %v3779_v28 = vld [vmem:[#allocation15_spill] sm:$0xff]  ;;  %v92_v38 = vld [vmem:[#allocation2 + $0x190] sm:$0xff] }
  0x65   :  { %2368 = vmatprep.subr.bf16.mxu1 %v2780_v22  ;;  %687 = vmatprep.mubr.f32.mxu1 %v3773_v3  ;;  %v2353_v42 = vpack.c.bf16 %v2920_v56, %v2909_v61  ;;  %v2355_v50 = vpack.c.bf16 %v2933_v2, %v2924_v10  ;;  %v2357_v60 = vpack.c.bf16 %v2950_v19, %v2939_v53  ;;  %v1017_v21 = vand.u32 4294901760, %v90_v47  ;;  %v76_v46 = vld [vmem:[#allocation2 + $0x110] sm:$0xff]  ;;  %v77_v63 = vld [vmem:[#allocation2 + $0x118] sm:$0xff] }
  0x66   :  { %v2359_v5 = vpack.c.bf16 %v2963_v11, %v2954_v44  ;;  %v2361_v30 = vpack.c.bf16 %v3001_v54, %v2969_v8  ;;  %v969_v26 = vand.u32 4294901760, %v74_v35  ;;  %v3138_v12 = vsub.f32 %v91_v59, %v1020_v25 }
  0x67   :  { %2346 = vmatpush3.bf16.msra.mxu0 %v2345_v33  ;;  %v3136_v43 = vsub.f32 %v90_v47, %v1017_v21 }
  0x68   :  { %2370 = vmatpush3.bf16.msra.mxu1 %v2787_v27  ;;  %2348 = vmatprep.subr.bf16.mxu0 %v2347_v41  ;;  %v1023_v41 = vand.u32 4294901760, %v92_v38  ;;  %v3710_v59 = vand.u32 4294901760, %v3138_v12 }
  0x69   :  { %2372 = vmatprep.subr.bf16.mxu1 %v2801_v39 }
  0x6b   :  { %2350 = vmatpush3.bf16.msra.mxu0 %v2349_v1  ;;  %v3782_v1 = vand.u32 4294901760, %v2909_v61 }
  0x6c   :  { %2374 = vmatpush3.bf16.msra.mxu1 %v2809_v45  ;;  %2352 = vmatprep.subr.bf16.mxu0 %v2351_v17  ;;  %v3783_v17 = vand.u32 4294901760, %v2920_v56  ;;  %v3788_v56 = vand.u32 4294901760, %v2954_v44  ;;  %v78_v44 = vld [vmem:[#allocation2 + $0x120] sm:$0xff] }
  0x6d   :  { %2376 = vmatprep.subr.bf16.mxu1 %v2831_v62 }
  0x6f   :  { %2354 = vmatpush3.bf16.msra.mxu0 %v2353_v42  ;;  %v2417_v42 = vpack.c.bf16 %v3783_v17, %v3782_v1  ;;  %v96_v17 = vld [vmem:[#allocation2 + $0x1b0] sm:$0xff] }
  0x70   :  { %2378 = vmatpush3.bf16.msra.mxu1 %v2847_v16  ;;  %2356 = vmatprep.subr.bf16.mxu0 %v2355_v50  ;;  %v94_v50 = vld [vmem:[#allocation2 + $0x1a0] sm:$0xff] }
  0x71   :  { %2380 = vmatprep.subr.bf16.mxu1 %v2862_v49 }
  0x73   :  { %2358 = vmatpush3.bf16.msra.mxu0 %v2357_v60  ;;  %v95_v60 = vld [vmem:[#allocation2 + $0x1a8] sm:$0xff] }
  0x74   :  { %2382 = vmatpush3.bf16.msra.mxu1 %v2877_v4  ;;  %2360 = vmatprep.subr.bf16.mxu0 %v2359_v5 }
  0x75   :  { %2384 = vmatprep.subr.bf16.mxu1 %v2892_v48 }
  0x77   :  { %2362 = vmatpush3.bf16.msra.mxu0 %v2361_v30  ;;  %v3791_v30 = vand.u32 4294901760, %v3001_v54 }
  0x78   :  { %2386 = vmatpush3.bf16.msra.mxu1 %v3774_v57  ;;  %2396 = vmatprep.subr.bf16.mxu0 %v2395_v9  ;;  %v972_v9 = vand.u32 4294901760, %v75_v31 }
  0x79   :  { %2388 = vmatprep.subr.bf16.mxu1 %v3775_v23 }
  0x7a   :  { %583 = vmatmul.mubr.f32.vlgmr.msra.gmra.mrb[2].mxu0 %v2997_v0  ;;  %v3142_v33 = vsub.f32 %v75_v31, %v972_v9  ;;  %v3784_v0 = vand.u32 4294901760, %v2924_v10  ;;  %v3789_v10 = vand.u32 4294901760, %v2963_v11 }
  0x7b   :  { %2398 = vmatpush3.bf16.msra.mxu0 %v2397_v13  ;;  %857 = vmatprep.mubr.f32.mxu0 %v3776_v29  ;;  %v93_v13 = vld [vmem:[#allocation2 + $0x198] sm:$0xff] }
  0x7c   :  { %2390 = vmatpush3.bf16.msra.mxu1 %v3777_v32  ;;  %2400 = vmatprep.subr.bf16.mxu0 %v2399_v7  ;;  %v3140_v7 = vsub.f32 %v74_v35, %v969_v26  ;;  %v1026_v3 = vand.u32 4294901760, %v93_v13  ;;  %v3174_v5 = vpack.c.bf16 %v3789_v10, %v3788_v56  ;;  %v79_v35 = vld [vmem:[#allocation2 + $0x128] sm:$0xff]  ;;  %v3701_v31 = vand.u32 4294901760, %v3142_v33 }
  0x7d   :  { %2392 = vmatprep.subr.bf16.mxu1 %v3778_v15 }
  0x7e   :  { %v3707_v11 = vand.u32 4294901760, %v3140_v7  ;;  %v3192_v54 = vpack.c.bf16 %v1026_v3, %v1023_v41 }
  0x7f   :  { %2402 = vmatpush3.bf16.msra.mxu0 %v2401_v18  ;;  %v3780_v18 = vand.u32 4294901760, %v2894_v51  ;;  %v975_v51 = vand.u32 4294901760, %v76_v46 }
  0x80   :  { %2394 = vmatpush3.bf16.msra.mxu1 %v3779_v28  ;;  %2404 = vmatprep.subr.bf16.mxu0 %v2403_v36  ;;  %v3781_v36 = vand.u32 4294901760, %v2903_v55  ;;  %v978_v55 = vand.u32 4294901760, %v77_v63  ;;  %3793 = vst [vmem:[#allocation12_spill] sm:$0xff] %v3192_v54 }
  0x81   :  { %2428 = vmatprep.subr.bf16.mxu1 %v2772_v14 }
  0x82   :  { %v2415_v14 = vpack.c.bf16 %v3781_v36, %v3780_v18  ;;  %v1032_v18 = vand.u32 4294901760, %v95_v60  ;;  %v3200_v36 = vpack.c.bf16 %v978_v55, %v975_v51 }
  0x83   :  { %691 = vmatmul.mubr.f32.vlgmr.msra.gmra.mrb[2].mxu1 %v210_v6  ;;  %2406 = vmatpush3.bf16.msra.mxu0 %v3070_v34  ;;  %v3785_v6 = vand.u32 4294901760, %v2933_v2  ;;  %v3790_v2 = vand.u32 4294901760, %v2969_v8  ;;  %v3190_v8 = vpack.c.bf16 %v972_v9, %v969_v26  ;;  %v981_v9 = vand.u32 4294901760, %v78_v44 }
  0x84   :  { %2430 = vmatpush3.bf16.msra.mxu1 %v2776_v20  ;;  %2408 = vmatprep.subr.bf16.mxu0 %v3076_v52  ;;  %v3786_v20 = vand.u32 4294901760, %v2939_v53  ;;  %v3787_v52 = vand.u32 4294901760, %v2950_v19  ;;  %v41_v53 = vld [vmem:[#allocation5 + $0x18] sm:$0xff]  ;;  %v3184_v19 = vpack.c.bf16 %v1020_v25, %v1017_v21  ;;  %v3196_v21 = vsub.f32 %v92_v38, %v1023_v41  ;;  %3794 = vst [vmem:[#allocation16_spill] sm:$0xff] %v3200_v36 }
  0x85   :  { %v3161_v34 = vpack.c.bf16 %v3785_v6, %v3784_v0  ;;  %2432 = vmatprep.subr.bf16.mxu1 %v2780_v22  ;;  %v3180_v47 = vpack.c.bf16 %v3791_v30, %v3790_v2  ;;  %961 = vmatprep.mubr.f32.mxu1 %v3776_v29  ;;  %v3711_v22 = vand.u32 4294901760, %v3136_v43  ;;  %3792 = vst [vmem:[#allocation11_spill] sm:$0xff] %v3190_v8  ;;  %v1029_v29 = vand.u32 4294901760, %v94_v50 }
  0x86   :  { %v3168_v61 = vpack.c.bf16 %v3787_v52, %v3786_v20  ;;  %v3198_v25 = vsub.f32 %v93_v13, %v1026_v3  ;;  %v3202_v1 = vand.u32 4294901760, %v41_v53  ;;  %v3210_v38 = vsub.f32 %v77_v63, %v978_v55  ;;  %v80_v52 = vld [vmem:[#allocation2 + $0x130] sm:$0xff] }
  0x87   :  { %2410 = vmatpush3.bf16.msra.mxu0 %v3082_v40  ;;  %v3205_v40 = vsub.f32 %v76_v46, %v975_v51  ;;  %v1196_v26 = vsub.f32 %v3136_v43, %v3711_v22  ;;  %v1203_v13 = vsub.f32 %v3138_v12, %v3710_v59  ;;  %v1091_v46 = vsub.f32 %v3142_v33, %v3701_v31  ;;  %v98_v31 = vld [vmem:[#allocation2 + $0x1c0] sm:$0xff]  ;;  %v85_v22 = vld [vmem:[#allocation2 + $0x158] sm:$0xff] }
  0x88   :  { %2434 = vmatpush3.bf16.msra.mxu1 %v2787_v27  ;;  %2412 = vmatprep.subr.bf16.mxu0 %v3088_v58  ;;  %3795 = vst [vmem:[#allocation13_spill] sm:$0xff] %v3202_v1  ;;  %v984_v27 = vand.u32 4294901760, %v79_v35  ;;  %v97_v58 = vld [vmem:[#allocation2 + $0x1b8] sm:$0xff]  ;;  %v3222_v41 = vpack.c.bf16 %v1032_v18, %v1029_v29  ;;  %v3224_v3 = vsub.f32 %v94_v50, %v1029_v29  ;;  %v1035_v6 = vand.u32 4294901760, %v96_v17 }
  0x89   :  { %2436 = vmatprep.subr.bf16.mxu1 %v2801_v39  ;;  %v1084_v39 = vsub.f32 %v3140_v7, %v3707_v11  ;;  %v3226_v63 = vsub.f32 %v95_v60, %v1032_v18  ;;  %v3229_v0 = vsub.f32 %v41_v53, %v3202_v1  ;;  %v1038_v51 = vand.u32 4294901760, %v97_v58 }
  0x8a   :  { %3796 = vst [vmem:[#allocation14_spill] sm:$0xff] %v3222_v41  ;;  %v3705_v55 = vand.u32 4294901760, %v3196_v21  ;;  %v3702_v20 = vand.u32 4294901760, %v3198_v25  ;;  %v1197_v50 = vand.u32 4294901760, %v1196_v26  ;;  %v3235_v56 = vpack.c.bf16 %v984_v27, %v981_v9 }
  0x8b   :  { %2414 = vmatpush3.bf16.msra.mxu0 %v3094_v24  ;;  %v81_v24 = vld [vmem:[#allocation2 + $0x138] sm:$0xff]  ;;  %v3237_v60 = vsub.f32 %v78_v44, %v981_v9  ;;  %v3239_v10 = vsub.f32 %v79_v35, %v984_v27  ;;  %v1204_v2 = vand.u32 4294901760, %v1203_v13  ;;  %v3704_v30 = vand.u32 4294901760, %v3205_v40  ;;  %v99_v27 = vld [vmem:[#allocation2 + $0x1c8] sm:$0xff] }
  0x8c   :  { %2438 = vmatpush3.bf16.msra.mxu1 %v2809_v45  ;;  %2416 = vmatprep.subr.bf16.mxu0 %v2415_v14  ;;  %3797 = vst [vmem:[#allocation15_spill] sm:$0xff] %v3235_v56  ;;  %v1085_v45 = vand.u32 4294901760, %v1084_v39  ;;  %v1092_v14 = vand.u32 4294901760, %v1091_v46  ;;  %v987_v53 = vand.u32 4294901760, %v80_v52  ;;  %v990_v29 = vand.u32 4294901760, %v81_v24 }
  0x8d   :  { %2440 = vmatprep.subr.bf16.mxu1 %v2831_v62  ;;  %v3703_v18 = vand.u32 4294901760, %v3210_v38  ;;  %v3714_v62 = vand.u32 4294901760, %v3229_v0  ;;  %v3246_v44 = vpack.c.bf16 %v1038_v51, %v1035_v6  ;;  %v1210_v35 = vsub.f32 %v3196_v21, %v3705_v55 }
  0x8e   :  { %v3255_v26 = vsub.f32 %v96_v17, %v1035_v6  ;;  %v3257_v9 = vsub.f32 %v97_v58, %v1038_v51  ;;  %v3261_v13 = vpack.c.bf16 %v1204_v2, %v1197_v50  ;;  %v3263_v39 = vpack.c.bf16 %v1092_v14, %v1085_v45 }
  0x8f   :  { %2418 = vmatpush3.bf16.msra.mxu0 %v2417_v42  ;;  %3798 = vst [vmem:[#allocation17_spill] sm:$0xff] %v3246_v44  ;;  %v1217_v42 = vsub.f32 %v3198_v25, %v3702_v20  ;;  %v1098_v46 = vsub.f32 %v3205_v40, %v3704_v30  ;;  %v1041_v20 = vand.u32 4294901760, %v98_v31  ;;  %v1105_v17 = vsub.f32 %v3210_v38, %v3703_v18 }
  0x90   :  { %2442 = vmatpush3.bf16.msra.mxu1 %v2847_v16  ;;  %2420 = vmatprep.subr.bf16.mxu0 %v3161_v34  ;;  %v3706_v16 = vand.u32 4294901760, %v3224_v3  ;;  %v3709_v34 = vand.u32 4294901760, %v3226_v63  ;;  %v3708_v58 = vand.u32 4294901760, %v3237_v60  ;;  %v1067_v6 = vsub.f32 %v3229_v0, %v3714_v62 }
  0x91   :  { %2444 = vmatprep.subr.bf16.mxu1 %v2862_v49  ;;  %v3269_v49 = vpack.c.bf16 %v990_v29, %v987_v53  ;;  %v1211_v51 = vand.u32 4294901760, %v1210_v35  ;;  %v1218_v50 = vand.u32 4294901760, %v1217_v42  ;;  %v1044_v2 = vand.u32 4294901760, %v99_v27  ;;  %v83_v42 = vld [vmem:[#allocation2 + $0x148] sm:$0xff] }
  0x92   :  { %v3713_v45 = vand.u32 4294901760, %v3239_v10  ;;  %v3282_v14 = vsub.f32 %v80_v52, %v987_v53  ;;  %v3284_v18 = vsub.f32 %v81_v24, %v990_v29  ;;  %v1224_v30 = vsub.f32 %v3224_v3, %v3706_v16  ;;  %v100_v29 = vld [vmem:[#allocation2 + $0x1d0] sm:$0xff]  ;;  %v101_v16 = vld [vmem:[#allocation2 + $0x1d8] sm:$0xff] }
  0x93   :  { %2422 = vmatpush3.bf16.msra.mxu0 %v3168_v61  ;;  %3799 = vst [vmem:[#allocation18_spill] sm:$0xff] %v3269_v49  ;;  %v82_v61 = vld [vmem:[#allocation2 + $0x140] sm:$0xff]  ;;  %v3292_v35 = vsub.f32 %v98_v31, %v1041_v20  ;;  %v3712_v55 = vand.u32 4294901760, %v3255_v26  ;;  %v1106_v52 = vand.u32 4294901760, %v1105_v17  ;;  %v1112_v53 = vsub.f32 %v3237_v60, %v3708_v58 }
  0x94   :  { %2446 = vmatpush3.bf16.msra.mxu1 %v2877_v4  ;;  %2424 = vmatprep.subr.bf16.mxu0 %v3174_v5  ;;  %v1231_v4 = vsub.f32 %v3226_v63, %v3709_v34  ;;  %v1099_v5 = vand.u32 4294901760, %v1098_v46  ;;  %v993_v24 = vand.u32 4294901760, %v82_v61  ;;  %v1068_v11 = vand.u32 4294901760, %v1067_v6  ;;  %v84_v6 = vld [vmem:[#allocation2 + $0x150] sm:$0xff] }
  0x95   :  { %2448 = vmatprep.subr.bf16.mxu1 %v2892_v48  ;;  %v3715_v48 = vand.u32 4294901760, %v3257_v9  ;;  %v3302_v31 = vpack.c.bf16 %v1218_v50, %v1211_v51  ;;  %v3304_v46 = vpack.c.bf16 %v1044_v2, %v1041_v20  ;;  %v3310_v17 = vsub.f32 %v99_v27, %v1044_v2 }
  0x96   :  { %v1225_v58 = vand.u32 4294901760, %v1224_v30  ;;  %v1232_v34 = vand.u32 4294901760, %v1231_v4  ;;  %v996_v59 = vand.u32 4294901760, %v83_v42  ;;  %v1050_v51 = vand.u32 4294901760, %v101_v16 }
  0x97   :  { %2426 = vmatpush3.bf16.msra.mxu0 %v3180_v47  ;;  %3800 = vst [vmem:[#allocation19_spill] sm:$0xff] %v3304_v46  ;;  %v1119_v47 = vsub.f32 %v3239_v10, %v3713_v45  ;;  %v1238_v20 = vsub.f32 %v3255_v26, %v3712_v55  ;;  %v1245_v50 = vsub.f32 %v3257_v9, %v3715_v48  ;;  %v1113_v27 = vand.u32 4294901760, %v1112_v53  ;;  %v102_v48 = vld [vmem:[#allocation2 + $0x1e0] sm:$0xff]  ;;  %v103_v53 = vld [vmem:[#allocation2 + $0x1e8] sm:$0xff] }
  0x98   :  { %2450 = vmatpush3.bf16.msra.mxu1 %v3774_v57  ;;  %2460 = vmatprep.subr.bf16.mxu0 %v3184_v19  ;;  %v1047_v57 = vand.u32 4294901760, %v100_v29  ;;  %v3322_v30 = vsub.f32 %v82_v61, %v993_v24  ;;  %v999_v55 = vand.u32 4294901760, %v84_v6  ;;  %v1002_v45 = vand.u32 4294901760, %v85_v22 }
  0x99   :  { %2452 = vmatprep.subr.bf16.mxu1 %v3775_v23  ;;  %v3320_v23 = vpack.c.bf16 %v1106_v52, %v1099_v5  ;;  %v1120_v4 = vand.u32 4294901760, %v1119_v47  ;;  %v3720_v62 = vand.u32 4294901760, %v3284_v18  ;;  %v3329_v5 = vpack.c.bf16 %v1232_v34, %v1225_v58 }
  0x9a   :  { %859 = vmatmul.mubr.f32.vlgmr.msra.gmra.mrb[4].mxu0 %v2984_v37  ;;  %v3331_v61 = vpack.c.bf16 %v996_v59, %v993_v24  ;;  %v3333_v52 = vsub.f32 %v83_v42, %v996_v59  ;;  %v1239_v2 = vand.u32 4294901760, %v1238_v20  ;;  %v1246_v47 = vand.u32 4294901760, %v1245_v50  ;;  %v3366_v50 = vld [vmem:[#allocation2 + $0x168] sm:$0xff] }
  0x9b   :  { %2462 = vmatpush3.bf16.msra.mxu0 %v3190_v8  ;;  %1069 = vmatprep.mubr.f32.mxu0 %v1068_v11  ;;  %v3722_v11 = vand.u32 4294901760, %v3292_v35  ;;  %v3339_v8 = vld [vmem:[#allocation2 + $0x160] sm:$0xff]  ;;  %v3344_v34 = vsub.f32 %v101_v16, %v1050_v51  ;;  %v3804_v59 = vand.u32 4294901760, %v3282_v14  ;;  %v1053_v42 = vand.u32 4294901760, %v102_v48 }
  0x9c   :  { %2454 = vmatpush3.bf16.msra.mxu1 %v3777_v32  ;;  %2464 = vmatprep.subr.bf16.mxu0 %v3192_v54  ;;  %v3336_v32 = vpack.c.bf16 %v1050_v51, %v1047_v57  ;;  %v3721_v54 = vand.u32 4294901760, %v3310_v17  ;;  %v3351_v24 = vpack.c.bf16 %v1120_v4, %v1113_v27  ;;  %v3353_v20 = vpack.c.bf16 %v1002_v45, %v999_v55 }
  0x9d   :  { %2456 = vmatprep.subr.bf16.mxu1 %v3778_v15  ;;  %v3342_v15 = vsub.f32 %v100_v29, %v1047_v57  ;;  %3803 = vst [vmem:[#allocation22_spill] sm:$0xff] %v3344_v34  ;;  %v1126_v58 = vsub.f32 %v3282_v14, %v3804_v59  ;;  %v1133_v29 = vsub.f32 %v3284_v18, %v3720_v62  ;;  %v1056_v57 = vand.u32 4294901760, %v103_v53 }
  0x9e   :  { %3801 = vst [vmem:[#allocation20_spill] sm:$0xff] %v3336_v32  ;;  %v3359_v16 = vsub.f32 %v84_v6, %v999_v55  ;;  %v3361_v51 = vsub.f32 %v85_v22, %v1002_v45  ;;  %v3723_v27 = vand.u32 4294901760, %v3339_v8  ;;  %v2503_v4 = vpack.c.bf16 %v1246_v47, %v1239_v2  ;;  %v3376_v22 = vld [vmem:[#allocation2 + $0x1f8] sm:$0xff]  ;;  %v3399_v2 = vld [vmem:[#allocation2 + $0x170] sm:$0xff] }
  0x9f   :  { %2466 = vmatpush3.bf16.msra.mxu0 %v3200_v36  ;;  %3802 = vst [vmem:[#allocation21_spill] sm:$0xff] %v3342_v15  ;;  %v1259_v59 = vsub.f32 %v3310_v17, %v3721_v54  ;;  %v1127_v45 = vand.u32 4294901760, %v1126_v58  ;;  %v3380_v6 = vsub.f32 %v102_v48, %v1053_v42  ;;  %v40_v54 = vld [vmem:[#allocation5 + $0x10] sm:$0xff]  ;;  %v3386_v55 = vpack.c.bf16 %v1056_v57, %v1053_v42  ;;  %v3401_v42 = vld [vmem:[#allocation2 + $0x178] sm:$0xff] }
  0xa0   :  { %2458 = vmatpush3.bf16.msra.mxu1 %v3779_v28  ;;  %2468 = vmatprep.subr.bf16.mxu0 %v3222_v41  ;;  %v1252_v28 = vsub.f32 %v3292_v35, %v3722_v11  ;;  %v1134_v11 = vand.u32 4294901760, %v1133_v29  ;;  %v3388_v62 = vsub.f32 %v103_v53, %v1056_v57  ;;  %v3395_v58 = vsub.f32 %v3339_v8, %v3723_v27 }
  0xa1   :  { %2492 = vmatprep.subr.bf16.mxu1 %v3261_v13  ;;  %v3374_v13 = vld [vmem:[#allocation2 + $0x1f0] sm:$0xff]  ;;  %v1260_v53 = vand.u32 4294901760, %v1259_v59  ;;  %v3805_v29 = vand.u32 4294901760, %v3322_v30  ;;  %v3806_v57 = vand.u32 4294901760, %v3333_v52  ;;  %v3410_v27 = vand.u32 4294901760, %v40_v54 }
  0xa2   :  { %v1253_v48 = vand.u32 4294901760, %v1252_v28  ;;  %v1059_v47 = vand.u32 4294901760, %v3374_v13  ;;  %v3808_v41 = vand.u32 4294901760, %v3344_v34 }
  0xa3   :  { %963 = vmatmul.mubr.f32.vlgmr.msra.gmra.mrb[4].mxu1 %v2984_v37  ;;  %2470 = vmatpush3.bf16.msra.mxu0 %v3235_v56  ;;  %v1008_v37 = vand.u32 4294901760, %v3366_v50  ;;  %v1147_v28 = vsub.f32 %v3333_v52, %v3806_v57  ;;  %v2505_v57 = vpack.c.bf16 %v1134_v11, %v1127_v45 }
  0xa4   :  { %2494 = vmatpush3.bf16.msra.mxu1 %v3263_v39  ;;  %2472 = vmatprep.subr.bf16.mxu0 %v3246_v44  ;;  %v1062_v39 = vand.u32 4294901760, %v3376_v22  ;;  %v3807_v44 = vand.u32 4294901760, %v3342_v15  ;;  %v1273_v59 = vsub.f32 %v3344_v34, %v3808_v41  ;;  %v3430_v41 = vsub.f32 %v3374_v13, %v1059_v47 }
  0xa5   :  { %2496 = vmatprep.subr.bf16.mxu1 %v3302_v31  ;;  %1305 = vmatprep.mubr.f32.mxu1 %v3202_v1  ;;  %v1140_v31 = vsub.f32 %v3322_v30, %v3805_v29  ;;  %v3424_v36 = vsub.f32 %v3366_v50, %v1008_v37  ;;  %v3744_v29 = vand.u32 4294901760, %v3388_v62  ;;  %v2507_v11 = vpack.c.bf16 %v1260_v53, %v1253_v48 }
  0xa6   :  { %v1266_v56 = vsub.f32 %v3342_v15, %v3807_v44  ;;  %v1014_v44 = vand.u32 4294901760, %v3401_v42  ;;  %v3433_v1 = vsub.f32 %v3376_v22, %v1062_v39  ;;  %v1148_v50 = vand.u32 4294901760, %v1147_v28 }
  0xa7   :  { %2474 = vmatpush3.bf16.msra.mxu0 %v3269_v49  ;;  %v1011_v49 = vand.u32 4294901760, %v3399_v2  ;;  %v1141_v45 = vand.u32 4294901760, %v1140_v31  ;;  %v3809_v13 = vand.u32 4294901760, %v3359_v16  ;;  %v3810_v22 = vand.u32 4294901760, %v3361_v51 }
  0xa8   :  { %2498 = vmatpush3.bf16.msra.mxu1 %v3320_v23  ;;  %2476 = vmatprep.subr.bf16.mxu0 %v3304_v46  ;;  %v3438_v46 = vsub.f32 %v40_v54, %v3410_v27  ;;  %v1267_v34 = vand.u32 4294901760, %v1266_v56  ;;  %v3453_v54 = vsub.f32 %v3401_v42, %v1014_v44  ;;  %v3811_v31 = vand.u32 4294901760, %v3380_v6 }
  0xa9   :  { %2500 = vmatprep.subr.bf16.mxu1 %v3329_v5  ;;  %v1274_v5 = vand.u32 4294901760, %v1273_v59  ;;  %v1154_v15 = vsub.f32 %v3359_v16, %v3809_v13  ;;  %v1161_v23 = vsub.f32 %v3361_v51, %v3810_v22  ;;  %v3450_v48 = vsub.f32 %v3399_v2, %v1011_v49 }
  0xaa   :  { %v1280_v28 = vsub.f32 %v3380_v6, %v3811_v31  ;;  %v1293_v59 = vand.u32 4294901760, %v3430_v41  ;;  %v3812_v42 = vand.u32 4294901760, %v3339_v8  ;;  %v3469_v22 = vpack.c.bf16 %v1062_v39, %v1059_v47 }
  0xab   :  { %2478 = vmatpush3.bf16.msra.mxu0 %v3331_v61  ;;  %v2509_v53 = vpack.c.bf16 %v1148_v50, %v1141_v45  ;;  %v2511_v31 = vpack.c.bf16 %v1274_v5, %v1267_v34  ;;  %v1155_v56 = vand.u32 4294901760, %v1154_v15  ;;  %v3814_v8 = vand.u32 4294901760, %v3424_v36 }
  0xac   :  { %2502 = vmatpush3.bf16.msra.mxu1 %v3351_v24  ;;  %2480 = vmatprep.subr.bf16.mxu0 %v3336_v32  ;;  %v1287_v24 = vsub.f32 %v3388_v62, %v3744_v29  ;;  %v3467_v13 = vpack.c.bf16 %v1008_v37, %v3812_v42  ;;  %v1162_v32 = vand.u32 4294901760, %v1161_v23  ;;  %v3813_v29 = vand.u32 4294901760, %v3395_v58 }
  0xad   :  { %2504 = vmatprep.subr.bf16.mxu1 %v2503_v4  ;;  %v1072_v4 = vand.u32 4294901760, %v3438_v46  ;;  %v1175_v47 = vsub.f32 %v3424_v36, %v3814_v8  ;;  %v3745_v37 = vand.u32 4294901760, %v3450_v48  ;;  %v3746_v39 = vand.u32 4294901760, %v3453_v54 }
  0xae   :  { %v1168_v2 = vsub.f32 %v3395_v58, %v3813_v29  ;;  %v1281_v45 = vand.u32 4294901760, %v1280_v28  ;;  %v1288_v34 = vand.u32 4294901760, %v1287_v24  ;;  %v1294_v15 = vsub.f32 %v3430_v41, %v1293_v59 }
  0xaf   :  { %2482 = vmatpush3.bf16.msra.mxu0 %v3353_v20  ;;  %v1073_v29 = vsub.f32 %v3438_v46, %v1072_v4  ;;  %v3492_v50 = vpack.c.bf16 %v1014_v44, %v1011_v49  ;;  %v2513_v5 = vpack.c.bf16 %v1162_v32, %v1155_v56  ;;  %v1176_v24 = vand.u32 4294901760, %v1175_v47 }
  0xb0   :  { %2506 = vmatpush3.bf16.msra.mxu1 %v2505_v57  ;;  %2484 = vmatprep.subr.bf16.mxu0 %v3386_v55  ;;  %v3815_v57 = vand.u32 4294901760, %v3433_v1  ;;  %v1169_v28 = vand.u32 4294901760, %v1168_v2  ;;  %v1182_v42 = vsub.f32 %v3450_v48, %v3745_v37  ;;  %v1189_v8 = vsub.f32 %v3453_v54, %v3746_v39 }
  0xb1   :  { %2508 = vmatprep.subr.bf16.mxu1 %v2507_v11  ;;  %v2523_v11 = vpack.c.bf16 %v3138_v12, %v3136_v43  ;;  %v2515_v49 = vpack.c.bf16 %v1288_v34, %v1281_v45  ;;  %v1295_v44 = vand.u32 4294901760, %v1294_v15  ;;  %v1074_v56 = vand.u32 4294901760, %v1073_v29  ;;  %v3816_v29 = vld [vmem:[#allocation11_spill] sm:$0xff] }
  0xb2   :  { %v1301_v23 = vsub.f32 %v3433_v1, %v3815_v57  ;;  %v2517_v2 = vpack.c.bf16 %v1176_v24, %v1169_v28  ;;  %v2527_v47 = vpack.c.bf16 %v3198_v25, %v3196_v21  ;;  %v1183_v57 = vand.u32 4294901760, %v1182_v42  ;;  %v3819_v24 = vld [vmem:[#allocation16_spill] sm:$0xff]  ;;  %v3820_v42 = vld [vmem:[#allocation21_spill] sm:$0xff] }
  0xb3   :  { %2486 = vmatpush3.bf16.msra.mxu0 %v3467_v13  ;;  %v1190_v37 = vand.u32 4294901760, %v1189_v8  ;;  %v2531_v34 = vpack.c.bf16 %v3226_v63, %v3224_v3  ;;  %v2533_v15 = vpack.c.bf16 %v3239_v10, %v3237_v60  ;;  %v2541_v28 = vpack.c.bf16 %v3333_v52, %v3322_v30  ;;  %v3821_v8 = vld [vmem:[#allocation22_spill] sm:$0xff] }
  0xb4   :  { %2510 = vmatpush3.bf16.msra.mxu1 %v2509_v53  ;;  %2488 = vmatprep.subr.bf16.mxu0 %v3469_v22  ;;  %v1302_v32 = vand.u32 4294901760, %v1301_v23  ;;  %v2525_v53 = vpack.c.bf16 %v3142_v33, %v3140_v7  ;;  %v2535_v23 = vpack.c.bf16 %v3257_v9, %v3255_v26 }
  0xb5   :  { %2512 = vmatprep.subr.bf16.mxu1 %v2511_v31  ;;  %v2529_v31 = vpack.c.bf16 %v3210_v38, %v3205_v40  ;;  %v2521_v45 = vpack.c.bf16 %v1190_v37, %v1183_v57  ;;  %v2537_v37 = vpack.c.bf16 %v3284_v18, %v3282_v14  ;;  %v2551_v57 = vpack.c.bf16 %v3433_v1, %v3430_v41 }
  0xb6   :  { %v2519_v39 = vpack.c.bf16 %v1302_v32, %v1295_v44  ;;  %v3822_v44 = vld [vmem:[#allocation14_spill] sm:$0xff]  ;;  %v2545_v32 = vpack.c.bf16 %v3361_v51, %v3359_v16 }
  0xb7   :  { %2490 = vmatpush3.bf16.msra.mxu0 %v3492_v50 }
  0xb8   :  { %2514 = vmatpush3.bf16.msra.mxu1 %v2513_v5  ;;  %2524 = vmatprep.subr.bf16.mxu0 %v2523_v11  ;;  %v3817_v5 = vld [vmem:[#allocation12_spill] sm:$0xff]  ;;  %v3818_v11 = vand.u32 4294901760, %v3229_v0 }
  0xb9   :  { %2516 = vmatprep.subr.bf16.mxu1 %v2515_v49  ;;  %v2543_v49 = vpack.c.bf16 %v3821_v8, %v3820_v42 }
  0xba   :  { %1075 = vmatmul.mubr.f32.vlgmr.msra.gmra.mrb[6].mxu0 %v1074_v56  ;;  %v3823_v56 = vld [vmem:[#allocation15_spill] sm:$0xff] }
  0xbb   :  { %2526 = vmatpush3.bf16.msra.mxu0 %v2525_v53  ;;  %1442 = vmatprep.mubr.f32.mxu0 %v3229_v0  ;;  %v2547_v0 = vpack.c.bf16 %v3388_v62, %v3380_v6  ;;  %v3824_v53 = vld [vmem:[#allocation17_spill] sm:$0xff] }
  0xbc   :  { %2518 = vmatpush3.bf16.msra.mxu1 %v2517_v2  ;;  %2528 = vmatprep.subr.bf16.mxu0 %v2527_v47  ;;  %v2549_v2 = vpack.c.bf16 %v3424_v36, %v3395_v58  ;;  %v3825_v47 = vld [vmem:[#allocation18_spill] sm:$0xff] }
  0xbd   :  { %2520 = vmatprep.subr.bf16.mxu1 %v2519_v39  ;;  %v2539_v39 = vpack.c.bf16 %v3310_v17, %v3292_v35 }
  0xbf   :  { %2530 = vmatpush3.bf16.msra.mxu0 %v2529_v31  ;;  %v3826_v31 = vld [vmem:[#allocation19_spill] sm:$0xff] }
  0xc0   :  { %2522 = vmatpush3.bf16.msra.mxu1 %v2521_v45  ;;  %2532 = vmatprep.subr.bf16.mxu0 %v2531_v34  ;;  %v2553_v45 = vpack.c.bf16 %v3453_v54, %v3450_v48  ;;  %v3827_v34 = vand.u32 4294901760, %v3136_v43  ;;  %v3834_v43 = vand.u32 4294901760, %v3205_v40  ;;  %v3840_v40 = vand.u32 4294901760, %v3239_v10 }
  0xc1   :  { %2556 = vmatprep.subr.bf16.mxu1 %v3184_v19  ;;  %v3845_v10 = vand.u32 4294901760, %v3292_v35  ;;  %v3850_v35 = vand.u32 4294901760, %v3821_v8  ;;  %v3856_v8 = vand.u32 4294901760, %v3424_v36 }
  0xc3   :  { %1307 = vmatmul.mubr.f32.vlgmr.msra.gmra.mrb[6].mxu1 %v3410_v27  ;;  %2534 = vmatpush3.bf16.msra.mxu0 %v2533_v15  ;;  %v3828_v15 = vand.u32 4294901760, %v3138_v12  ;;  %v3835_v12 = vand.u32 4294901760, %v3210_v38  ;;  %v3841_v38 = vand.u32 4294901760, %v3255_v26  ;;  %v3846_v26 = vand.u32 4294901760, %v3310_v17 }
  0xc4   :  { %2558 = vmatpush3.bf16.msra.mxu1 %v3816_v29  ;;  %2536 = vmatprep.subr.bf16.mxu0 %v2535_v23  ;;  %v3851_v17 = vand.u32 4294901760, %v3359_v16  ;;  %v3857_v16 = vand.u32 4294901760, %v3433_v1 }
  0xc5   :  { %2560 = vmatprep.subr.bf16.mxu1 %v3817_v5  ;;  %1549 = vmatprep.mubr.f32.mxu1 %v3818_v11  ;;  %v2587_v23 = vpack.c.bf16 %v3828_v15, %v3827_v34  ;;  %v3831_v11 = vand.u32 4294901760, %v3142_v33  ;;  %v3836_v33 = vld [vmem:[#allocation13_spill] sm:$0xff]  ;;  %v3842_v34 = vand.u32 4294901760, %v3257_v9  ;;  %v2603_v9 = vpack.c.bf16 %v3846_v26, %v3845_v10 }
  0xc7   :  { %2538 = vmatpush3.bf16.msra.mxu0 %v2537_v37  ;;  %v3829_v37 = vld [vmem:[#allocation20_spill] sm:$0xff]  ;;  %v2599_v15 = vpack.c.bf16 %v3842_v34, %v3841_v38 }
  0xc8   :  { %2562 = vmatpush3.bf16.msra.mxu1 %v3819_v24  ;;  %2540 = vmatprep.subr.bf16.mxu0 %v2539_v39  ;;  %v3830_v39 = vand.u32 4294901760, %v3140_v7  ;;  %v2593_v7 = vpack.c.bf16 %v3835_v12, %v3834_v43 }
  0xc9   :  { %2564 = vmatprep.subr.bf16.mxu1 %v3822_v44 }
  0xcb   :  { %2542 = vmatpush3.bf16.msra.mxu0 %v2541_v28  ;;  %v2589_v28 = vpack.c.bf16 %v3831_v11, %v3830_v39 }
  0xcc   :  { %2566 = vmatpush3.bf16.msra.mxu1 %v3823_v56  ;;  %2544 = vmatprep.subr.bf16.mxu0 %v2543_v49  ;;  %v3832_v49 = vand.u32 4294901760, %v3196_v21  ;;  %v3837_v21 = vand.u32 4294901760, %v3224_v3  ;;  %v3843_v3 = vand.u32 4294901760, %v3282_v14  ;;  %v3848_v14 = vand.u32 4294901760, %v3333_v52 }
  0xcd   :  { %2568 = vmatprep.subr.bf16.mxu1 %v3824_v53  ;;  %v3854_v52 = vand.u32 4294901760, %v3388_v62  ;;  %v3858_v62 = vand.u32 4294901760, %v3450_v48 }
  0xcf   :  { %2546 = vmatpush3.bf16.msra.mxu0 %v2545_v32  ;;  %v3833_v32 = vand.u32 4294901760, %v3198_v25  ;;  %v3838_v25 = vand.u32 4294901760, %v3226_v63  ;;  %v3844_v63 = vand.u32 4294901760, %v3284_v18  ;;  %v3849_v18 = vand.u32 4294901760, %v3820_v42 }
  0xd0   :  { %2570 = vmatpush3.bf16.msra.mxu1 %v3825_v47  ;;  %2548 = vmatprep.subr.bf16.mxu0 %v2547_v0  ;;  %v3855_v42 = vand.u32 4294901760, %v3395_v58 }
  0xd1   :  { %2572 = vmatprep.subr.bf16.mxu1 %v3826_v31  ;;  %v2591_v0 = vpack.c.bf16 %v3833_v32, %v3832_v49 }
  0xd3   :  { %2550 = vmatpush3.bf16.msra.mxu0 %v2549_v2  ;;  %v2595_v2 = vpack.c.bf16 %v3838_v25, %v3837_v21 }
  0xd4   :  { %2574 = vmatpush3.bf16.msra.mxu1 %v3331_v61  ;;  %2552 = vmatprep.subr.bf16.mxu0 %v2551_v57  ;;  %v3839_v57 = vand.u32 4294901760, %v3237_v60  ;;  %v2601_v60 = vpack.c.bf16 %v3844_v63, %v3843_v3 }
  0xd5   :  { %2576 = vmatprep.subr.bf16.mxu1 %v3829_v37 }
  0xd7   :  { %2554 = vmatpush3.bf16.msra.mxu0 %v2553_v45  ;;  %v2597_v45 = vpack.c.bf16 %v3840_v40, %v3839_v57 }
  0xd8   :  { %2578 = vmatpush3.bf16.msra.mxu1 %v3353_v20  ;;  %2588 = vmatprep.subr.bf16.mxu0 %v2587_v23 }
  0xd9   :  { %2580 = vmatprep.subr.bf16.mxu1 %v3386_v55 }
  0xda   :  { %1445 = vmatmul.mubr.f32.vlgmr.msra.gmra.mrb[8].mxu0 %v3438_v46 }
  0xdb   :  { %2590 = vmatpush3.bf16.msra.mxu0 %v2589_v28  ;;  %1719 = vmatprep.mubr.f32.mxu0 %v3836_v33 }
  0xdc   :  { %2582 = vmatpush3.bf16.msra.mxu1 %v3467_v13  ;;  %2592 = vmatprep.subr.bf16.mxu0 %v2591_v0 }
  0xdd   :  { %2584 = vmatprep.subr.bf16.mxu1 %v3469_v22 }
  0xdf   :  { %2594 = vmatpush3.bf16.msra.mxu0 %v2593_v7 }
  0xe0   :  { %2586 = vmatpush3.bf16.msra.mxu1 %v3492_v50  ;;  %2596 = vmatprep.subr.bf16.mxu0 %v2595_v2 }
  0xe1   :  { %2620 = vmatprep.subr.bf16.mxu1 %v3184_v19  ;;  %v3847_v19 = vand.u32 4294901760, %v3322_v30  ;;  %v3853_v30 = vand.u32 4294901760, %v3380_v6  ;;  %v3859_v6 = vand.u32 4294901760, %v3453_v54 }
  0xe3   :  { %1553 = vmatmul.mubr.f32.vlgmr.msra.gmra.mrb[8].mxu1 %v1072_v4  ;;  %2598 = vmatpush3.bf16.msra.mxu0 %v2597_v45  ;;  %v2605_v46 = vpack.c.bf16 %v3848_v14, %v3847_v19  ;;  %v2607_v4 = vpack.c.bf16 %v3850_v35, %v3849_v18 }
  0xe4   :  { %2622 = vmatpush3.bf16.msra.mxu1 %v3816_v29  ;;  %2600 = vmatprep.subr.bf16.mxu0 %v2599_v15  ;;  %v3852_v29 = vand.u32 4294901760, %v3361_v51  ;;  %v2615_v51 = vpack.c.bf16 %v3857_v16, %v1293_v59 }
  0xe5   :  { %2624 = vmatprep.subr.bf16.mxu1 %v3817_v5  ;;  %1823 = vmatprep.mubr.f32.mxu1 %v3836_v33 }
  0xe6   :  { %v2609_v5 = vpack.c.bf16 %v3852_v29, %v3851_v17 }
  0xe7   :  { %2602 = vmatpush3.bf16.msra.mxu0 %v2601_v60 }
  0xe8   :  { %2626 = vmatpush3.bf16.msra.mxu1 %v3819_v24  ;;  %2604 = vmatprep.subr.bf16.mxu0 %v2603_v9  ;;  %v2611_v24 = vpack.c.bf16 %v3854_v52, %v3853_v30 }
  0xe9   :  { %2628 = vmatprep.subr.bf16.mxu1 %v3822_v44  ;;  %v2613_v44 = vpack.c.bf16 %v3856_v8, %v3855_v42 }
  0xeb   :  { %2606 = vmatpush3.bf16.msra.mxu0 %v2605_v46 }
  0xec   :  { %2630 = vmatpush3.bf16.msra.mxu1 %v3823_v56  ;;  %2608 = vmatprep.subr.bf16.mxu0 %v2607_v4  ;;  %v2617_v56 = vpack.c.bf16 %v3859_v6, %v3858_v62 }
  0xed   :  { %2632 = vmatprep.subr.bf16.mxu1 %v3824_v53 }
  0xef   :  { %2610 = vmatpush3.bf16.msra.mxu0 %v2609_v5 }
  0xf0   :  { %2634 = vmatpush3.bf16.msra.mxu1 %v3825_v47  ;;  %2612 = vmatprep.subr.bf16.mxu0 %v2611_v24 }
  0xf1   :  { %2636 = vmatprep.subr.bf16.mxu1 %v3826_v31 }
  0xf3   :  { %2614 = vmatpush3.bf16.msra.mxu0 %v2613_v44 }
  0xf4   :  { %2638 = vmatpush3.bf16.msra.mxu1 %v3331_v61  ;;  %2616 = vmatprep.subr.bf16.mxu0 %v2615_v51 }
  0xf5   :  { %2640 = vmatprep.subr.bf16.mxu1 %v3829_v37 }
  0xf7   :  { %2618 = vmatpush3.bf16.msra.mxu0 %v2617_v56 }
  0xf8   :  { %2642 = vmatpush3.bf16.msra.mxu1 %v3353_v20 }
  0xf9   :  { %2644 = vmatprep.subr.bf16.mxu1 %v3386_v55 }
  0xfa   :  { %1721 = vmatmul.mubr.f32.vlgmr.msra.gmra.mrb[10].mxu0 %v3410_v27 }
  0xfc   :  { %2646 = vmatpush3.bf16.msra.mxu1 %v3467_v13 }
  0xfd   :  { %2648 = vmatprep.subr.bf16.mxu1 %v3469_v22 }
 0x100   :  { %2650 = vmatpush3.bf16.msra.mxu1 %v3492_v50 }
 0x103   :  { %1825 = vmatmul.mubr.f32.vlgmr.msra.gmra.mrb[10].mxu1 %v3410_v27 }
 0x12d   :  { %v1879_v36 = vpop.f32.mrb[0].mxu0 }
 0x12e   :  { %v1880_v1 = vpop.f32.mrb[1].mxu0 }
 0x12f   :  { %v1881_v61 = vadd.f32 %v1880_v1, %v1879_v36 }
 0x136   :  { %v1914_v58 = vpop.f32.mrb[0].mxu1 }
 0x137   :  { %v1915_v41 = vpop.f32.mrb[1].mxu1 }
 0x138   :  { %v1916_v48 = vadd.f32 %v1915_v41, %v1914_v58 }
 0x13a   :  { %v447_v54 = vadd.f32 %v1916_v48, %v1881_v61 }
 0x14d   :  { %v1949_v20 = vpop.f32.mrb[2].mxu0 }
 0x14e   :  { %v1950_v59 = vpop.f32.mrb[3].mxu0 }
 0x14f   :  { %v1951_v55 = vadd.f32 %v1950_v59, %v1949_v20 }
 0x151   :  { %v585_v53 = vadd.f32 %v1951_v55, %v447_v54 }
 0x156   :  { %v1984_v47 = vpop.f32.mrb[2].mxu1 }
 0x157   :  { %v1985_v31 = vpop.f32.mrb[3].mxu1 }
 0x158   :  { %v1986_v13 = vadd.f32 %v1985_v31, %v1984_v47 }
 0x15a   :  { %v693_v23 = vadd.f32 %v1986_v13, %v585_v53 }
 0x16d   :  { %v2019_v22 = vpop.f32.mrb[4].mxu0 }
 0x16e   :  { %v2020_v37 = vpop.f32.mrb[5].mxu0 }
 0x16f   :  { %v2021_v50 = vadd.f32 %v2020_v37, %v2019_v22 }
 0x171   :  { %v861_v39 = vadd.f32 %v2021_v50, %v693_v23 }
 0x176   :  { %v2054_v27 = vpop.f32.mrb[4].mxu1 }
 0x177   :  { %v2055_v11 = vpop.f32.mrb[5].mxu1 }
 0x178   :  { %v2056_v28 = vadd.f32 %v2055_v11, %v2054_v27 }
 0x17a   :  { %v965_v49 = vadd.f32 %v2056_v28, %v861_v39 }
 0x18d   :  { %v2089_v32 = vpop.f32.mrb[6].mxu0 }
 0x18e   :  { %v2090_v0 = vpop.f32.mrb[7].mxu0 }
 0x18f   :  { %v2091_v43 = vadd.f32 %v2090_v0, %v2089_v32 }
 0x191   :  { %v1077_v12 = vadd.f32 %v2091_v43, %v965_v49 }
 0x196   :  { %v2124_v7 = vpop.f32.mrb[6].mxu1 }
 0x197   :  { %v2125_v33 = vpop.f32.mrb[7].mxu1 }
 0x198   :  { %v2126_v21 = vadd.f32 %v2125_v33, %v2124_v7 }
 0x19a   :  { %v1309_v25 = vadd.f32 %v2126_v21, %v1077_v12 }
 0x1ad   :  { %v2159_v2 = vpop.f32.mrb[8].mxu0 }
 0x1ae   :  { %v2160_v57 = vpop.f32.mrb[9].mxu0 }
 0x1af   :  { %v2161_v40 = vadd.f32 %v2160_v57, %v2159_v2 }
 0x1b1   :  { %v1447_v45 = vadd.f32 %v2161_v40, %v1309_v25 }
 0x1b6   :  { %v2194_v38 = vpop.f32.mrb[8].mxu1 }
 0x1b7   :  { %v2195_v34 = vpop.f32.mrb[9].mxu1 }
 0x1b8   :  { %v2196_v15 = vadd.f32 %v2195_v34, %v2194_v38 }
 0x1ba   :  { %v1555_v3 = vadd.f32 %v2196_v15, %v1447_v45 }
 0x1cd   :  { %v2229_v63 = vpop.f32.mrb[10].mxu0 }
 0x1ce   :  { %v2230_v60 = vpop.f32.mrb[11].mxu0 }
 0x1cf   :  { %v2231_v10 = vadd.f32 %v2230_v60, %v2229_v63 }
 0x1d1   :  { %v1723_v26 = vadd.f32 %v2231_v10, %v1555_v3 }
 0x1d6   :  { %v2264_v9 = vpop.f32.mrb[10].mxu1 }
 0x1d7   :  { %v2265_v19 = vpop.f32.mrb[11].mxu1 }
 0x1d8   :  { %v2266_v14 = vadd.f32 %v2265_v19, %v2264_v9 }
 0x1da   :  { %v1827_v46 = vadd.f32 %v2266_v14, %v1723_v26 }
 0x1dc   :  { %1830 = vst [vmem:[#allocation7] sm:$0xff] %v1827_v46 }
 0x1dd   :  { %2711 = shalt.err (!%p2708_p6)
}
 0x1de   :  { %s2712_s10 = scalar_lea.hbm %s3655_s2, 128 }
 0x1df   :  { %p2713_p7 = scmp.ne.s32.totalorder %s3655_s2, %s2712_s10  ;;  %p2716_p8 = scmp.lt.u32.totalorder %s2712_s10, %s3655_s2 }
 0x1e1   :  { %p2718_p9 = pnand %p2716_p8, %p2713_p7 }
 0x1e3   :  { %2721 = shalt.err (!%p2718_p9)
}
 0x1e4   :  { %1840 = dma.vmem_to_hbm [thread:$0]  %s1838_s6, 128, %s3655_s2, [#allocation4]  }
 0x1e5   :  { %2726 = dma.done.wait [#allocation4], 128  }
 0x1e6   :  { %2727 = vsyncadd [#allocation4], 4294967168 }
 0x1e7   :  { %1844 = vsyncpa [#allocation3], 1 }
 0x1e8   :  { %1845 = vsyncpa [#allocation6], 1 }
 0x1e9   :  { %1846 = vsyncpa [#allocation4], 1 }

</bundles_post_ra>
